<compile_context>
chip_gen: v5e
topology: v5e:2x2
jax: 0.10.0
libtpu: 0.0.40
codegen_flags: <defaults>
</compile_context>

<pallas_src>
import functools

import jax
import jax.numpy as jnp
from jax.experimental import pallas as pl
from jax.experimental.pallas import tpu as pltpu


def _round_up(x, m):
    return ((x + m - 1) // m) * m


def _linear_module_kernel(p_ref, q_ref, s_ref, bph_ref, bqh_ref,
                          p_out_ref, q_out_ref, *, layers):
    # p_ref/q_ref: (TN, d); s_ref: (layers, d, d) already symmetrized with h
    # folded in; bph_ref/bqh_ref: (1, d) already multiplied by h.
    p = p_ref[...]
    q = q_ref[...]
    # `layers` is static & small -> unroll at trace time (the p/q alternation
    # is static, so unrolling keeps it branch-free).
    # TODO(synk): for very large `layers`, switch to lax.fori_loop over layer
    # pairs to bound vreg live ranges / instruction-stream size.
    for i in range(layers):
        S_h = s_ref[i]  # (d, d), (S + S^T) * h
        if i % 2 == 0:
            p = p + jnp.dot(q, S_h, preferred_element_type=jnp.float32)
        else:
            q = jnp.dot(p, S_h, preferred_element_type=jnp.float32) + q
    p_out_ref[...] = (p + bph_ref[...]).astype(p_out_ref.dtype)
    q_out_ref[...] = (q + bqh_ref[...]).astype(q_out_ref.dtype)


def linear_module_forward(p, q, h, S_stack, bp, bq, *, batch_tile=1024):
    """Pallas TPU implementation of LinearModule.forward.

    Args:
      p, q:    [N, d] float32
      h:       python float or 0-d array (step size)
      S_stack: [layers, d, d] float32
      bp, bq:  [d] float32
    Returns:
      (p_out, q_out) each [N, d] float32
    """
    N, d = p.shape
    layers = S_stack.shape[0]

    h_f32 = jnp.asarray(h, jnp.float32)

    # ---- Hoist all loop-invariant work into the wrapper --------------------
    # Symmetrize and fold the step size into the weights (loop-invariant).
    S_sym_h = (S_stack.astype(jnp.float32)
               + jnp.swapaxes(S_stack.astype(jnp.float32), -1, -2)) * h_f32
    bph = (bp.astype(jnp.float32) * h_f32).reshape((1, d))
    bqh = (bq.astype(jnp.float32) * h_f32).reshape((1, d))

    # Batch tiling: multiple of 8 sublanes; last dim stays at d (full-extent
    # block, so no lane padding / extra HBM traffic is needed).
    TN = min(batch_tile, _round_up(N, 8))
    TN = _round_up(TN, 8)

    # VMEM budget: keep resident bytes comfortably under the v7x 64 MiB cap.
    # VMEM layout pads lanes to 128 and sublanes to 8 internally, so budget
    # with padded tile sizes even though HBM arrays are unpadded.
    d_vmem = _round_up(max(d, 1), 128)

    def _vmem_estimate(tn):
        s_bytes = layers * _round_up(d, 8) * d_vmem * 4   # resident weights
        pq_bytes = 2 * 2 * 2 * tn * d_vmem * 4            # (p,q) x in/out x dbl-buf
        bias_bytes = 2 * 8 * d_vmem * 4
        return s_bytes + pq_bytes + bias_bytes

    budget = 48 * 1024 * 1024
    while _vmem_estimate(TN) > budget and TN > 8:
        TN = max(8, _round_up(TN // 2, 8))
    # TODO(synk): if layers*d_vmem^2*4 alone exceeds the budget, stream S layer
    # by layer with pltpu.emit_pipeline instead of keeping the stack resident.

    N_pad = _round_up(max(N, TN), TN)
    n_blocks = N_pad // TN

    # Pad the batch only when needed (zero rows compute bias-only outputs and
    # are sliced away below).
    p_in = p.astype(jnp.float32)
    q_in = q.astype(jnp.float32)
    if N_pad != N:
        p_in = jnp.pad(p_in, ((0, N_pad - N), (0, 0)))
        q_in = jnp.pad(q_in, ((0, N_pad - N), (0, 0)))
    # TODO(synk): optionally cast p/q/S to bfloat16 for MXU throughput (keep
    # preferred_element_type=f32); left in f32 to preserve exact numerics.

    kernel = functools.partial(_linear_module_kernel, layers=layers)

    pq_spec = pl.BlockSpec((TN, d), lambda i: (i, 0))
    s_spec = pl.BlockSpec((layers, d, d), lambda i: (0, 0, 0))
    b_spec = pl.BlockSpec((1, d), lambda i: (0, 0))

    vmem_limit = int(min(max(_vmem_estimate(TN) * 2, 32 * 1024 * 1024),
                         96 * 1024 * 1024))

    p_out_pad, q_out_pad = pl.pallas_call(
        kernel,
        out_shape=(jax.ShapeDtypeStruct((N_pad, d), jnp.float32),
                   jax.ShapeDtypeStruct((N_pad, d), jnp.float32)),
        grid=(n_blocks,),
        in_specs=[pq_spec, pq_spec, s_spec, b_spec, b_spec],
        out_specs=(pq_spec, pq_spec),
        compiler_params=pltpu.CompilerParams(
            dimension_semantics=("parallel",),
            vmem_limit_bytes=vmem_limit),
    )(p_in, q_in, S_sym_h, bph, bqh)

    if N_pad != N:
        return p_out_pad[:N], q_out_pad[:N]
    return p_out_pad, q_out_pad


def _reference_forward(p, q, h, S_stack, bp, bq):
    """Pure-JAX reference mirroring the PyTorch module."""
    layers = S_stack.shape[0]
    for i in range(layers):
        S = S_stack[i]
        if i % 2 == 0:
            p = p + (q @ (S + S.T)) * h
        else:
            q = (p @ (S + S.T)) * h + q
    return p + bp * h, q + bq * h


if __name__ == "__main__":
    # Deterministic synthetic setup (matches __init__ shapes: S_i ~ N(0, 0.01),
    # bp = bq = 0 -- we use a nonzero bp here to exercise the epilogue).
    dim = 32          # -> d = 16
    d = dim // 2
    layers = 5        # odd layer count exercises both p- and q-update branches
    N = 10            # batch not a multiple of 8 -> exercises batch padding
    h = 0.1

    key = jax.random.PRNGKey(0)
    k_p, k_q, k_s, k_b = jax.random.split(key, 4)
    p = jax.random.normal(k_p, (N, d), dtype=jnp.float32)
    q = jax.random.normal(k_q, (N, d), dtype=jnp.float32)
    S_stack = jax.random.normal(k_s, (layers, d, d), dtype=jnp.float32) * 0.01
    bp = jax.random.normal(k_b, (d,), dtype=jnp.float32) * 0.01
    bq = jnp.zeros((d,), jnp.float32)

    p_out, q_out = linear_module_forward(p, q, h, S_stack, bp, bq)
    p_out = jax.block_until_ready(p_out)
    q_out = jax.block_until_ready(q_out)

    # Correctness check against a pure-JAX reference.
    p_ref, q_ref = _reference_forward(p, q, h, S_stack, bp, bq)
    assert p_out.shape == (N, d) and q_out.shape == (N, d)
    assert jnp.allclose(p_out, p_ref, atol=1e-5, rtol=1e-5)
    assert jnp.allclose(q_out, q_ref, atol=1e-5, rtol=1e-5)

    print("KERNEL_OK")
</pallas_src>

<mosaic_0001>
module attributes {stable_mosaic.version = 11 : i64} {
  func.func @_linear_module_kernel(%arg0: i32, %arg1: memref<16x16xf32, #tpu.memory_space<vmem>>, %arg2: memref<16x16xf32, #tpu.memory_space<vmem>>, %arg3: memref<5x16x16xf32, #tpu.memory_space<vmem>>, %arg4: memref<1x16xf32, #tpu.memory_space<vmem>>, %arg5: memref<1x16xf32, #tpu.memory_space<vmem>>, %arg6: memref<16x16xf32, #tpu.memory_space<vmem>>, %arg7: memref<16x16xf32, #tpu.memory_space<vmem>>) attributes {dimension_semantics = [#tpu.dimension_semantics<parallel>], iteration_bounds = array<i64: 1>, scalar_prefetch = 0 : i64, scratch_operands = 0 : i64, tpu.core_type = #tpu.core_type<tc>, window_params = [{transform_indices = @transform_0, window_bounds = array<i64: 16, 16>}, {transform_indices = @transform_1, window_bounds = array<i64: 16, 16>}, {pipeline_mode = #tpu.pipeline_mode<synchronous>, transform_indices = @transform_2, window_bounds = array<i64: 5, 16, 16>}, {pipeline_mode = #tpu.pipeline_mode<synchronous>, transform_indices = @transform_3, window_bounds = array<i64: 1, 16>}, {pipeline_mode = #tpu.pipeline_mode<synchronous>, transform_indices = @transform_4, window_bounds = array<i64: 1, 16>}, {transform_indices = @transform_5, window_bounds = array<i64: 16, 16>}, {transform_indices = @transform_6, window_bounds = array<i64: 16, 16>}]} {
    %c0 = arith.constant 0 : index
    %c0_0 = arith.constant 0 : index
    %0 = vector.load %arg1[%c0, %c0_0] : memref<16x16xf32, #tpu.memory_space<vmem>>, vector<16x16xf32>
    %c0_1 = arith.constant 0 : index
    %c0_2 = arith.constant 0 : index
    %1 = vector.load %arg2[%c0_1, %c0_2] : memref<16x16xf32, #tpu.memory_space<vmem>>, vector<16x16xf32>
    %c0_3 = arith.constant 0 : index
    %c0_4 = arith.constant 0 : index
    %c0_5 = arith.constant 0 : index
    %2 = vector.load %arg3[%c0_3, %c0_4, %c0_5] : memref<5x16x16xf32, #tpu.memory_space<vmem>>, vector<1x16x16xf32>
    %3 = vector.shape_cast %2 : vector<1x16x16xf32> to vector<16x16xf32>
    %cst = arith.constant dense<0.000000e+00> : vector<16x16xf32>
    %4 = tpu.matmul %1, %3, %cst {dimension_numbers = #tpu.dot_dimension_numbers<[1], [0], [0], [1], [0, 0, 1, 1], [], []>} : vector<16x16xf32>, vector<16x16xf32>, vector<16x16xf32> -> vector<16x16xf32>
    %5 = arith.addf %0, %4 : vector<16x16xf32>
    %c1 = arith.constant 1 : index
    %c0_6 = arith.constant 0 : index
    %c0_7 = arith.constant 0 : index
    %6 = vector.load %arg3[%c1, %c0_6, %c0_7] : memref<5x16x16xf32, #tpu.memory_space<vmem>>, vector<1x16x16xf32>
    %7 = vector.shape_cast %6 : vector<1x16x16xf32> to vector<16x16xf32>
    %cst_8 = arith.constant dense<0.000000e+00> : vector<16x16xf32>
    %8 = tpu.matmul %5, %7, %cst_8 {dimension_numbers = #tpu.dot_dimension_numbers<[1], [0], [0], [1], [0, 0, 1, 1], [], []>} : vector<16x16xf32>, vector<16x16xf32>, vector<16x16xf32> -> vector<16x16xf32>
    %9 = arith.addf %8, %1 : vector<16x16xf32>
    %c2 = arith.constant 2 : index
    %c0_9 = arith.constant 0 : index
    %c0_10 = arith.constant 0 : index
    %10 = vector.load %arg3[%c2, %c0_9, %c0_10] : memref<5x16x16xf32, #tpu.memory_space<vmem>>, vector<1x16x16xf32>
    %11 = vector.shape_cast %10 : vector<1x16x16xf32> to vector<16x16xf32>
    %cst_11 = arith.constant dense<0.000000e+00> : vector<16x16xf32>
    %12 = tpu.matmul %9, %11, %cst_11 {dimension_numbers = #tpu.dot_dimension_numbers<[1], [0], [0], [1], [0, 0, 1, 1], [], []>} : vector<16x16xf32>, vector<16x16xf32>, vector<16x16xf32> -> vector<16x16xf32>
    %13 = arith.addf %5, %12 : vector<16x16xf32>
    %c3 = arith.constant 3 : index
    %c0_12 = arith.constant 0 : index
    %c0_13 = arith.constant 0 : index
    %14 = vector.load %arg3[%c3, %c0_12, %c0_13] : memref<5x16x16xf32, #tpu.memory_space<vmem>>, vector<1x16x16xf32>
    %15 = vector.shape_cast %14 : vector<1x16x16xf32> to vector<16x16xf32>
    %cst_14 = arith.constant dense<0.000000e+00> : vector<16x16xf32>
    %16 = tpu.matmul %13, %15, %cst_14 {dimension_numbers = #tpu.dot_dimension_numbers<[1], [0], [0], [1], [0, 0, 1, 1], [], []>} : vector<16x16xf32>, vector<16x16xf32>, vector<16x16xf32> -> vector<16x16xf32>
    %17 = arith.addf %16, %9 : vector<16x16xf32>
    %c4 = arith.constant 4 : index
    %c0_15 = arith.constant 0 : index
    %c0_16 = arith.constant 0 : index
    %18 = vector.load %arg3[%c4, %c0_15, %c0_16] : memref<5x16x16xf32, #tpu.memory_space<vmem>>, vector<1x16x16xf32>
    %19 = vector.shape_cast %18 : vector<1x16x16xf32> to vector<16x16xf32>
    %cst_17 = arith.constant dense<0.000000e+00> : vector<16x16xf32>
    %20 = tpu.matmul %17, %19, %cst_17 {dimension_numbers = #tpu.dot_dimension_numbers<[1], [0], [0], [1], [0, 0, 1, 1], [], []>} : vector<16x16xf32>, vector<16x16xf32>, vector<16x16xf32> -> vector<16x16xf32>
    %21 = arith.addf %13, %20 : vector<16x16xf32>
    %c0_18 = arith.constant 0 : index
    %c0_19 = arith.constant 0 : index
    %22 = vector.load %arg4[%c0_18, %c0_19] : memref<1x16xf32, #tpu.memory_space<vmem>>, vector<1x16xf32>
    %23 = vector.broadcast %22 : vector<1x16xf32> to vector<16x16xf32>
    %24 = arith.addf %21, %23 : vector<16x16xf32>
    %c0_20 = arith.constant 0 : index
    %c0_21 = arith.constant 0 : index
    %25 = vector.load %arg6[%c0_20, %c0_21] : memref<16x16xf32, #tpu.memory_space<vmem>>, vector<16x16xf32>
    tpu.vector_store %arg6[%c0_20, %c0_21], %24 {strides = array<i32>} : memref<16x16xf32, #tpu.memory_space<vmem>>, vector<16x16xf32>,
    %c0_22 = arith.constant 0 : index
    %c0_23 = arith.constant 0 : index
    %26 = vector.load %arg5[%c0_22, %c0_23] : memref<1x16xf32, #tpu.memory_space<vmem>>, vector<1x16xf32>
    %27 = vector.broadcast %26 : vector<1x16xf32> to vector<16x16xf32>
    %28 = arith.addf %17, %27 : vector<16x16xf32>
    %c0_24 = arith.constant 0 : index
    %c0_25 = arith.constant 0 : index
    %29 = vector.load %arg7[%c0_24, %c0_25] : memref<16x16xf32, #tpu.memory_space<vmem>>, vector<16x16xf32>
    tpu.vector_store %arg7[%c0_24, %c0_25], %28 {strides = array<i32>} : memref<16x16xf32, #tpu.memory_space<vmem>>, vector<16x16xf32>,
    return
  }
  func.func @transform_0(%arg0: i32) -> (i32, i32) {
    %c0_i32 = arith.constant 0 : i32
    %c0_i32_0 = arith.constant 0 : i32
    return %arg0, %c0_i32 : i32, i32
  }
  func.func @transform_1(%arg0: i32) -> (i32, i32) {
    %c0_i32 = arith.constant 0 : i32
    %c0_i32_0 = arith.constant 0 : i32
    return %arg0, %c0_i32 : i32, i32
  }
  func.func @transform_2(%arg0: i32) -> (i32, i32, i32) {
    %c0_i32 = arith.constant 0 : i32
    %c0_i32_0 = arith.constant 0 : i32
    %c0_i32_1 = arith.constant 0 : i32
    %c0_i32_2 = arith.constant 0 : i32
    return %c0_i32, %c0_i32_0, %c0_i32_1 : i32, i32, i32
  }
  func.func @transform_3(%arg0: i32) -> (i32, i32) {
    %c0_i32 = arith.constant 0 : i32
    %c0_i32_0 = arith.constant 0 : i32
    %c0_i32_1 = arith.constant 0 : i32
    return %c0_i32, %c0_i32_0 : i32, i32
  }
  func.func @transform_4(%arg0: i32) -> (i32, i32) {
    %c0_i32 = arith.constant 0 : i32
    %c0_i32_0 = arith.constant 0 : i32
    %c0_i32_1 = arith.constant 0 : i32
    return %c0_i32, %c0_i32_0 : i32, i32
  }
  func.func @transform_5(%arg0: i32) -> (i32, i32) {
    %c0_i32 = arith.constant 0 : i32
    %c0_i32_0 = arith.constant 0 : i32
    return %arg0, %c0_i32 : i32, i32
  }
  func.func @transform_6(%arg0: i32) -> (i32, i32) {
    %c0_i32 = arith.constant 0 : i32
    %c0_i32_0 = arith.constant 0 : i32
    return %arg0, %c0_i32 : i32, i32
  }
}

</mosaic_0001>

<bundles_post_ra>
// kernel: tpu_custom_call.1
= control target key start
LH: loop header
LB: loop body
LE: loop exit
PB: predicated region body
PF: predicated region fallthrough
CT: control target
= control target key end

     0   :  { %12 = vsyncpa [#allocation3], 0  ;;  %s536_s0 = inlined_call_operand.hbm [shape: f32[16,16], index: 0, kind: input, shape index: {}]   ;;  %s537_s1 = inlined_call_operand.hbm [shape: f32[16,16], index: 1, kind: input, shape index: {}]   ;;  %s538_s2 = inlined_call_operand.hbm [shape: f32[5,16,16], index: 2, kind: input, shape index: {}]   ;;  %s539_s3 = inlined_call_operand.vmem [shape: f32[1,16], index: 3, kind: input, shape index: {}]   ;;  %s540_s4 = inlined_call_operand.vmem [shape: f32[1,16], index: 4, kind: input, shape index: {}]   ;;  %s541_s5 = inlined_call_operand.hbm [shape: f32[16,16], index: 5, kind: output, shape index: {0}]   ;;  %s542_s6 = inlined_call_operand.hbm [shape: f32[16,16], index: 6, kind: output, shape index: {1}]  }
   0x1   :  { %13 = vsyncpa [#allocation6], 0 }
   0x2   :  { %14 = vsyncpa [#allocation4], 0 }
   0x3   :  { %15 = vsyncpa [#allocation10], 0  ;;  %s33_s23 = sshll.u32 %s537_s1, 4  ;;  %s444_s24 = smov [#allocation5]   ;;  %s34_s23 = int_to_ptr.hbm [resolvable:$true] %s33_s23 }
   0x4   :  { %s35_s25 = sshll.u32 %s444_s24, 4  ;;  %s20_s28 = sshll.u32 %s536_s0, 4  ;;  %s36_s25 = int_to_ptr.vmem [resolvable:$true] %s35_s25  ;;  %s21_s28 = int_to_ptr.hbm [resolvable:$true] %s20_s28 }
   0x5   :  { %s445_s29 = smov 128   ;;  %s446_s30 = smov 8  }
   0x6   :  { %41 = dma.hbm_to_vmem [thread:$0]  %s34_s23, 256, %s36_s25, [#allocation6], %s445_s29, %s445_s29, %s446_s30  }
   0x7   :  { %s447_s7 = smov [#allocation2]   ;;  %s46_s1 = sshll.u32 %s538_s2, 4  ;;  %s47_s1 = int_to_ptr.hbm [resolvable:$true] %s46_s1 }
   0x8   :  { %s22_s8 = sshll.u32 %s447_s7, 4  ;;  %s448_s0 = smov [#allocation7]   ;;  %s23_s8 = int_to_ptr.vmem [resolvable:$true] %s22_s8 }
   0x9   :  { %28 = dma.hbm_to_vmem [thread:$0]  %s21_s28, 256, %s23_s8, [#allocation3], %s445_s29, %s445_s29, %s446_s30  }
   0xa   :  { %s48_s11 = sshll.u32 %s448_s0, 4  ;;  %s49_s11 = int_to_ptr.vmem [resolvable:$true] %s48_s11 }
   0xb   :  { %54 = dma.hbm_to_vmem [thread:$0]  %s47_s1, 1280, %s49_s11, [#allocation6], %s445_s29, %s445_s29, %s446_s30  }
   0xc   :  { %436 = dma.done.wait [#allocation3], 256  }
   0xd   :  { %437 = vsyncadd [#allocation3], 4294967040 }
   0xe   :  { %438 = dma.done.wait [#allocation6], 1536  }
   0xf   :  { %439 = vsyncadd [#allocation6], 4294965760  ;;  %v76_v0 = vld [vmem:[#allocation7 + $0x8] sm:$0xff]  ;;  %v75_v1 = vld [vmem:[#allocation7] sm:$0xff]  ;;  %vm77_vm0 = vcmask 130048   ;;  %s449_s13 = smov [#allocation9]  }
  0x10   :  { %98 = vmatpush.msra.mxu0 %v76_v0  ;;  %v73_v2 = vld [vmem:[#allocation5] sm:$0xff]  ;;  %305 = vmatpush.msra.mxu1 %v76_v0  ;;  %v74_v3 = vld [vmem:[#allocation5 + $0x8] sm:$0xff]  ;;  %v71_v6 = vld [vmem:[#allocation2] sm:$0xff]  ;;  %s274_s14 = sshll.u32 %s449_s13, 4  ;;  %s450_s19 = smov [#allocation8]   ;;  %s275_s14 = int_to_ptr.vmem [resolvable:$true] %s274_s14 }
  0x11   :  { %v111_v4 = vld [vmem:[#allocation7 + $0x18] sm:$0xff]  ;;  %v110_v5 = vld [vmem:[#allocation7 + $0x10] sm:$0xff]  ;;  %v72_v9 = vld [vmem:[#allocation2 + $0x8] sm:$0xff]  ;;  %s261_s20 = sshll.u32 %s450_s19, 4  ;;  %s263_s22 = sshll.u32 %s541_s5, 4  ;;  %s262_s20 = int_to_ptr.vmem [resolvable:$true] %s261_s20  ;;  %s264_s22 = int_to_ptr.hbm [resolvable:$true] %s263_s22 }
  0x12   :  { %99 = vmatpush.msra.mxu0 %v75_v1  ;;  %306 = vmatpush.msra.mxu1 %v75_v1  ;;  %v143_v12 = vld [vmem:[#allocation7 + $0x28] sm:$0xff]  ;;  %v142_v13 = vld [vmem:[#allocation7 + $0x20] sm:$0xff]  ;;  %v177_v18 = vld [vmem:[#allocation7 + $0x38] sm:$0xff] }
  0x13   :  { %295 = vmatmul.msk.f32.vlgmr.msra.gmra.mxu0 %vm77_vm0, %v73_v2  ;;  %296 = vmatmul.msk.f32.vlgmr.msra.gmra.mxu1 %vm77_vm0, %v74_v3  ;;  %v176_v19 = vld [vmem:[#allocation7 + $0x30] sm:$0xff]  ;;  %v209_v20 = vld [vmem:[#allocation7 + $0x48] sm:$0xff]  ;;  %v208_v21 = vld [vmem:[#allocation7 + $0x40] sm:$0xff] }
  0x14   :  { %132 = vmatpush.msrb.mxu1 %v111_v4  ;;  %164 = vmatpush.msra.mxu2 %v143_v12  ;;  %v314_v26 = vld [vmem:[%s540_s4] ss:$0 sm:$0xff]  ;;  %s276_s4 = sshll.u32 %s542_s6, 4  ;;  %s277_s4 = int_to_ptr.hbm [resolvable:$true] %s276_s4 }
  0x15   :  { %198 = vmatpush.msra.mxu3 %v177_v18  ;;  %230 = vmatpush.msrb.mxu0 %v209_v20  ;;  %v315_v33 = vld [vmem:[%s539_s3] ss:$0 sm:$0xff] }
  0x16   :  { %133 = vmatpush.msrb.mxu1 %v110_v5  ;;  %165 = vmatpush.msra.mxu2 %v142_v13 }
  0x17   :  { %199 = vmatpush.msra.mxu3 %v176_v19  ;;  %231 = vmatpush.msrb.mxu0 %v208_v21 }
  0x90   :  { %v101_v7 = vpop.f32.mrf.mxu0  ;;  %v104_v10 = vpop.f32.mrf.mxu1 }
  0x91   :  { %v107_v8 = vadd.f32 %v101_v7, %v71_v6  ;;  %v108_v11 = vadd.f32 %v104_v10, %v72_v9 }
  0x93   :  { %297 = vmatmul.msk.f32.vlgmr.msrb.gmra.mxu1 %vm77_vm0, %v107_v8 }
  0x9b   :  { %298 = vmatmul.msk.f32.gmra.mxu1 %vm77_vm0, %v108_v11 }
 0x110   :  { %v135_v14 = vpop.f32.mrf.mxu1 }
 0x111   :  { %v136_v15 = vadd.f32 %v135_v14, %v73_v2 }
 0x113   :  { %299 = vmatmul.msk.f32.vlgmr.msra.gmra.mxu2 %vm77_vm0, %v136_v15 }
 0x118   :  { %v138_v16 = vpop.f32.mrf.mxu1 }
 0x119   :  { %v139_v17 = vadd.f32 %v138_v16, %v74_v3 }
 0x11b   :  { %300 = vmatmul.msk.f32.gmra.mxu2 %vm77_vm0, %v139_v17 }
 0x196   :  { %v167_v22 = vpop.f32.mrf.mxu2 }
 0x197   :  { %v173_v23 = vadd.f32 %v167_v22, %v107_v8 }
 0x199   :  { %301 = vmatmul.msk.f32.vlgmr.msra.gmra.mxu3 %vm77_vm0, %v173_v23 }
 0x19e   :  { %v170_v24 = vpop.f32.mrf.mxu2 }
 0x19f   :  { %v174_v25 = vadd.f32 %v170_v24, %v108_v11 }
 0x1a1   :  { %302 = vmatmul.msk.f32.gmra.mxu3 %vm77_vm0, %v174_v25 }
 0x21c   :  { %v201_v27 = vpop.f32.mrf.mxu3 }
 0x21d   :  { %v202_v28 = vadd.f32 %v201_v27, %v136_v15 }
 0x21f   :  { %v253_v29 = vadd.f32 %v314_v26, %v202_v28  ;;  %303 = vmatmul.msk.f32.vlgmr.msrb.gmra.mxu0 %vm77_vm0, %v202_v28 }
 0x221   :  { %255 = vst.msk [vmem:[#allocation9] sm:$0xff] %vm77_vm0, %v253_v29 }
 0x224   :  { %v204_v30 = vpop.f32.mrf.mxu3 }
 0x225   :  { %v205_v31 = vadd.f32 %v204_v30, %v139_v17 }
 0x227   :  { %v254_v32 = vadd.f32 %v314_v26, %v205_v31  ;;  %304 = vmatmul.msk.f32.gmra.mxu0 %vm77_vm0, %v205_v31 }
 0x229   :  { %256 = vst.msk [vmem:[#allocation9 + $0x8] sm:$0xff] %vm77_vm0, %v254_v32 }
 0x22a   :  { %282 = dma.vmem_to_hbm [thread:$0]  %s275_s14, 256, %s277_s4, [#allocation10], %s445_s29, %s445_s29, %s446_s30  }
 0x29c   :  { %v233_v34 = vpop.f32.mrf.mxu0 }
 0x29d   :  { %v239_v35 = vadd.f32 %v233_v34, %v173_v23 }
 0x29f   :  { %v245_v36 = vadd.f32 %v315_v33, %v239_v35 }
 0x2a1   :  { %247 = vst.msk [vmem:[#allocation8] sm:$0xff] %vm77_vm0, %v245_v36 }
 0x2a4   :  { %v236_v37 = vpop.f32.mrf.mxu0 }
 0x2a5   :  { %v240_v38 = vadd.f32 %v236_v37, %v174_v25 }
 0x2a7   :  { %v246_v39 = vadd.f32 %v315_v33, %v240_v38 }
 0x2a9   :  { %248 = vst.msk [vmem:[#allocation8 + $0x8] sm:$0xff] %vm77_vm0, %v246_v39 }
 0x2aa   :  { %269 = dma.vmem_to_hbm [thread:$0]  %s262_s20, 256, %s264_s22, [#allocation4], %s445_s29, %s445_s29, %s446_s30  }
 0x2ab   :  { %440 = dma.done.wait [#allocation4], 256  }
 0x2ac   :  { %441 = vsyncadd [#allocation4], 4294967040 }
 0x2ad   :  { %442 = dma.done.wait [#allocation10], 256  }
 0x2ae   :  { %443 = vsyncadd [#allocation10], 4294967040 }
 0x2af   :  { %291 = vsyncpa [#allocation3], 1 }
 0x2b0   :  { %292 = vsyncpa [#allocation6], 1 }
 0x2b1   :  { %293 = vsyncpa [#allocation4], 1 }
 0x2b2   :  { %294 = vsyncpa [#allocation10], 1 }

</bundles_post_ra>
